<compile_context>
chip_gen: v7x
topology: tpu7x:2x2x1
jax: 0.10.0
libtpu: 0.0.40
codegen_flags: <defaults>
</compile_context>

<pallas_src>
import jax
import jax.numpy as jnp
from jax import lax
from jax.experimental import pallas as pl
from jax.experimental.pallas import tpu as pltpu

WIN = 16          # win_size
IN_CH = 29        # input audio feature channels
DIM_AUD = 76      # output dim
LEAK = 0.02       # LeakyReLU negative slope
OUT_PAD = 128     # lane-padded output width (>= DIM_AUD)

_CONV_SPECS = ((29, 32), (32, 32), (32, 64), (64, 64))   # (c_in, c_out), k=3 s=2 p=1
_KERNEL_ORDER = ("w1", "b1", "w2", "b2", "w3", "b3", "w4", "b4",
                 "wf1", "bf1", "wf2", "bf2")


def _lrelu(x):
    return jnp.where(x >= 0, x, LEAK * x)


def _audionet_kernel(x_ref,
                     w1_ref, b1_ref, w2_ref, b2_ref, w3_ref, b3_ref,
                     w4_ref, b4_ref, wf1_ref, bf1_ref, wf2_ref, bf2_ref,
                     out_ref):
    # bf16 operands on the MXU, f32 accumulation; bias add + LeakyReLU in f32.
    def dot(h, w_ref):
        return jnp.dot(h.astype(jnp.bfloat16), w_ref[...],
                       preferred_element_type=jnp.float32)

    h = _lrelu(dot(x_ref[...], w1_ref) + b1_ref[...])   # conv1 -> (TILE, 8*32)
    h = _lrelu(dot(h, w2_ref) + b2_ref[...])            # conv2 -> (TILE, 4*32)
    h = _lrelu(dot(h, w3_ref) + b3_ref[...])            # conv3 -> (TILE, 2*64)
    h = _lrelu(dot(h, w4_ref) + b4_ref[...])            # conv4 -> (TILE, 64)
    h = _lrelu(dot(h, wf1_ref) + bf1_ref[...])          # fc1   -> (TILE, 64)
    # fc2 -> (TILE, 128): single lane-dense bf16 store (halves writeback bytes).
    out_ref[...] = (dot(h, wf2_ref) + bf2_ref[...]).astype(jnp.bfloat16)


def _conv_to_dense(w, b, l_in):
    """Fold Conv1d(k=3, stride=2, pad=1) into a dense matmul over the
    time-major / channel-minor flattened layout: (l_in*c_in, l_out*c_out)."""
    c_out, c_in, k = w.shape
    l_out = (l_in + 2 - k) // 2 + 1
    dense = jnp.zeros((l_in, c_in, l_out, c_out), jnp.float32)
    for t_out in range(l_out):
        for kk in range(k):
            t_in = t_out * 2 + kk - 1
            if 0 <= t_in < l_in:
                dense = dense.at[t_in, :, t_out, :].set(w[:, :, kk].T)
    dense = dense.reshape(l_in * c_in, l_out * c_out)
    bias = jnp.broadcast_to(b[None, :], (l_out, c_out)).reshape(1, l_out * c_out)
    return dense, bias, l_out


def init_params(key):
    keys = iter(jax.random.split(key, 16))

    def uniform(shape, fan_in):
        bound = float(fan_in) ** -0.5
        return jax.random.uniform(next(keys), shape, jnp.float32, -bound, bound)

    conv_raw = []
    for c_in, c_out in _CONV_SPECS:
        w = uniform((c_out, c_in, 3), c_in * 3)
        b = uniform((c_out,), c_in * 3)
        conv_raw.append((w, b))
    fc1_w = uniform((64, 64), 64)
    fc1_b = uniform((64,), 64)
    fc2_w = uniform((DIM_AUD, 64), 64)
    fc2_b = uniform((DIM_AUD,), 64)

    # Kernel-side params: densified convs, transposed linears, bf16 weights
    # (pre-cast once), f32 (1, C) biases for in-kernel broadcasting.
    kp = {}
    l = WIN
    for i, (w, b) in enumerate(conv_raw, start=1):
        dense, bias, l = _conv_to_dense(w, b, l)
        kp[f"w{i}"] = dense.astype(jnp.bfloat16)
        kp[f"b{i}"] = bias
    kp["wf1"] = fc1_w.T.astype(jnp.bfloat16)
    kp["bf1"] = fc1_b.reshape(1, 64)
    wf2 = jnp.zeros((64, OUT_PAD), jnp.float32).at[:, :DIM_AUD].set(fc2_w.T)
    bf2 = jnp.zeros((1, OUT_PAD), jnp.float32).at[:, :DIM_AUD].set(fc2_b)
    kp["wf2"] = wf2.astype(jnp.bfloat16)
    kp["bf2"] = bf2

    return dict(conv_raw=conv_raw, fc1_w=fc1_w, fc1_b=fc1_b,
                fc2_w=fc2_w, fc2_b=fc2_b, kernel=kp)


def _choose_tile(n):
    """Large tiles amortize the ~0.35 us/step pipeline overhead; for batches
    with >=3 tiles of work, guarantee >=2 grid steps so v7x's two TensorCores
    both get work.  Tiny batches use the smallest 8-aligned tile."""
    n8 = ((n + 7) // 8) * 8
    if n8 <= 16:
        return n8
    half = ((-(-n8 // 2)) + 7) // 8 * 8       # round_up(ceil(n8/2), 8)
    return min(1024, half)


def _vmem_limit(tile, weight_bytes):
    in_bytes = 2 * tile * (WIN * IN_CH) * 4       # double-buffered f32 input
    out_bytes = 2 * tile * OUT_PAD * 2            # double-buffered bf16 output
    scratch = tile * 4096                         # generous intermediates slack
    est = in_bytes + out_bytes + 2 * weight_bytes + scratch + (4 << 20)
    return int(min(48 * 1024 * 1024, max(16 * 1024 * 1024, est)))


@jax.jit
def audionet_pallas(x, params):
    half_w = WIN // 2
    h = x[:, 8 - half_w:8 + half_w, :]                  # (N, 16, 29)
    n = h.shape[0]
    # time-major / channel-minor flatten; stays f32 (cast to bf16 in-kernel).
    flat = h.reshape(n, WIN * IN_CH)

    tile = _choose_tile(n)
    pad = (-n) % tile
    flat_p = jnp.pad(flat, ((0, pad), (0, 0))) if pad else flat
    n_p = n + pad

    kp = params["kernel"]
    weights = [kp[k] for k in _KERNEL_ORDER]
    weight_bytes = sum(int(w.size) * w.dtype.itemsize for w in weights)

    def full_spec(arr):
        nd = arr.ndim
        return pl.BlockSpec(arr.shape, lambda i, _nd=nd: (0,) * _nd)

    out = pl.pallas_call(
        _audionet_kernel,
        out_shape=jax.ShapeDtypeStruct((n_p, OUT_PAD), jnp.bfloat16),
        grid=(n_p // tile,),
        in_specs=[pl.BlockSpec((tile, WIN * IN_CH), lambda i: (i, 0))]
                 + [full_spec(w) for w in weights],
        out_specs=pl.BlockSpec((tile, OUT_PAD), lambda i: (i, 0)),
        compiler_params=pltpu.CompilerParams(
            dimension_semantics=("parallel",),
            vmem_limit_bytes=_vmem_limit(tile, weight_bytes)),
    )(flat_p, *weights)

    out = out[:n, :DIM_AUD].astype(jnp.float32)
    return jnp.squeeze(out)        # matches the PyTorch .squeeze()


def reference(x, params):
    half_w = WIN // 2
    h = x[:, 8 - half_w:8 + half_w, :]
    h = jnp.transpose(h, (0, 2, 1))                     # (N, 29, 16)
    for w, b in params["conv_raw"]:
        h = lax.conv_general_dilated(
            h, w, window_strides=(2,), padding=((1, 1),),
            dimension_numbers=("NCH", "OIH", "NCH"))
        h = _lrelu(h + b[None, :, None])
    h = h[:, :, 0]                                      # squeeze(-1) -> (N, 64)
    h = _lrelu(h @ params["fc1_w"].T + params["fc1_b"])
    out = h @ params["fc2_w"].T + params["fc2_b"]
    return jnp.squeeze(out)


if __name__ == "__main__":
    key = jax.random.PRNGKey(0)
    kparam, kx1, kx2 = jax.random.split(key, 3)
    params = init_params(kparam)

    # Case 1: tiny batch (single grid step, no padding).
    x_small = jax.random.normal(kx1, (8, WIN, IN_CH), jnp.float32)
    out_small = jax.block_until_ready(audionet_pallas(x_small, params))
    ref_small = reference(x_small, params)
    assert out_small.shape == (8, DIM_AUD), out_small.shape
    err_s = float(jnp.max(jnp.abs(out_small - ref_small)))
    assert jnp.allclose(out_small, ref_small, rtol=3e-2, atol=3e-2), err_s

    # Case 2: batch exercising padding + >=2 grid steps (megacore path).
    x_big = jax.random.normal(kx2, (24, WIN, IN_CH), jnp.float32)
    out_big = jax.block_until_ready(audionet_pallas(x_big, params))
    ref_big = reference(x_big, params)
    assert out_big.shape == (24, DIM_AUD), out_big.shape
    err_b = float(jnp.max(jnp.abs(out_big - ref_big)))
    assert jnp.allclose(out_big, ref_big, rtol=3e-2, atol=3e-2), err_b

    print("KERNEL_OK")
</pallas_src>

<mosaic_0001>
module attributes {stable_mosaic.version = 11 : i64} {
  func.func @_audionet_kernel(%arg0: i32, %arg1: memref<8x464xf32, #tpu.memory_space<vmem>>, %arg2: memref<464x256xbf16, #tpu.memory_space<vmem>>, %arg3: memref<1x256xf32, #tpu.memory_space<vmem>>, %arg4: memref<256x128xbf16, #tpu.memory_space<vmem>>, %arg5: memref<1x128xf32, #tpu.memory_space<vmem>>, %arg6: memref<128x128xbf16, #tpu.memory_space<vmem>>, %arg7: memref<1x128xf32, #tpu.memory_space<vmem>>, %arg8: memref<128x64xbf16, #tpu.memory_space<vmem>>, %arg9: memref<1x64xf32, #tpu.memory_space<vmem>>, %arg10: memref<64x64xbf16, #tpu.memory_space<vmem>>, %arg11: memref<1x64xf32, #tpu.memory_space<vmem>>, %arg12: memref<64x128xbf16, #tpu.memory_space<vmem>>, %arg13: memref<1x128xf32, #tpu.memory_space<vmem>>, %arg14: memref<8x128xbf16, #tpu.memory_space<vmem>>) attributes {dimension_semantics = [#tpu.dimension_semantics<parallel>], iteration_bounds = array<i64: 1>, scalar_prefetch = 0 : i64, scratch_operands = 0 : i64, tpu.core_type = #tpu.core_type<tc>, window_params = [{transform_indices = @transform_0, window_bounds = array<i64: 8, 464>}, {pipeline_mode = #tpu.pipeline_mode<synchronous>, transform_indices = @transform_1, window_bounds = array<i64: 464, 256>}, {pipeline_mode = #tpu.pipeline_mode<synchronous>, transform_indices = @transform_2, window_bounds = array<i64: 1, 256>}, {pipeline_mode = #tpu.pipeline_mode<synchronous>, transform_indices = @transform_3, window_bounds = array<i64: 256, 128>}, {pipeline_mode = #tpu.pipeline_mode<synchronous>, transform_indices = @transform_4, window_bounds = array<i64: 1, 128>}, {pipeline_mode = #tpu.pipeline_mode<synchronous>, transform_indices = @transform_5, window_bounds = array<i64: 128, 128>}, {pipeline_mode = #tpu.pipeline_mode<synchronous>, transform_indices = @transform_6, window_bounds = array<i64: 1, 128>}, {pipeline_mode = #tpu.pipeline_mode<synchronous>, transform_indices = @transform_7, window_bounds = array<i64: 128, 64>}, {pipeline_mode = #tpu.pipeline_mode<synchronous>, transform_indices = @transform_8, window_bounds = array<i64: 1, 64>}, {pipeline_mode = #tpu.pipeline_mode<synchronous>, transform_indices = @transform_9, window_bounds = array<i64: 64, 64>}, {pipeline_mode = #tpu.pipeline_mode<synchronous>, transform_indices = @transform_10, window_bounds = array<i64: 1, 64>}, {pipeline_mode = #tpu.pipeline_mode<synchronous>, transform_indices = @transform_11, window_bounds = array<i64: 64, 128>}, {pipeline_mode = #tpu.pipeline_mode<synchronous>, transform_indices = @transform_12, window_bounds = array<i64: 1, 128>}, {transform_indices = @transform_13, window_bounds = array<i64: 8, 128>}]} {
    %c0 = arith.constant 0 : index
    %c0_0 = arith.constant 0 : index
    %0 = vector.load %arg1[%c0, %c0_0] : memref<8x464xf32, #tpu.memory_space<vmem>>, vector<8x464xf32>
    %1 = arith.truncf %0 : vector<8x464xf32> to vector<8x464xbf16>
    %c0_1 = arith.constant 0 : index
    %c0_2 = arith.constant 0 : index
    %2 = vector.load %arg2[%c0_1, %c0_2] : memref<464x256xbf16, #tpu.memory_space<vmem>>, vector<464x256xbf16>
    %cst = arith.constant dense<0.000000e+00> : vector<8x256xf32>
    %3 = tpu.matmul %1, %2, %cst {dimension_numbers = #tpu.dot_dimension_numbers<[1], [0], [0], [1], [0, 0, 1, 1], [], []>} : vector<8x464xbf16>, vector<464x256xbf16>, vector<8x256xf32> -> vector<8x256xf32>
    %c0_3 = arith.constant 0 : index
    %c0_4 = arith.constant 0 : index
    %4 = vector.load %arg3[%c0_3, %c0_4] : memref<1x256xf32, #tpu.memory_space<vmem>>, vector<1x256xf32>
    %5 = vector.broadcast %4 : vector<1x256xf32> to vector<8x256xf32>
    %6 = arith.addf %3, %5 : vector<8x256xf32>
    %cst_5 = arith.constant 0.000000e+00 : f32
    %7 = vector.broadcast %cst_5 : f32 to vector<8x256xf32>
    %8 = arith.cmpf oge, %6, %7 : vector<8x256xf32>
    %cst_6 = arith.constant 2.000000e-02 : f32
    %9 = vector.broadcast %cst_6 : f32 to vector<8x256xf32>
    %10 = arith.mulf %9, %6 : vector<8x256xf32>
    %11 = arith.select %8, %6, %10 : vector<8x256xi1>, vector<8x256xf32>
    %12 = arith.truncf %11 : vector<8x256xf32> to vector<8x256xbf16>
    %c0_7 = arith.constant 0 : index
    %c0_8 = arith.constant 0 : index
    %13 = vector.load %arg4[%c0_7, %c0_8] : memref<256x128xbf16, #tpu.memory_space<vmem>>, vector<256x128xbf16>
    %cst_9 = arith.constant dense<0.000000e+00> : vector<8x128xf32>
    %14 = tpu.matmul %12, %13, %cst_9 {dimension_numbers = #tpu.dot_dimension_numbers<[1], [0], [0], [1], [0, 0, 1, 1], [], []>} : vector<8x256xbf16>, vector<256x128xbf16>, vector<8x128xf32> -> vector<8x128xf32>
    %c0_10 = arith.constant 0 : index
    %c0_11 = arith.constant 0 : index
    %15 = vector.load %arg5[%c0_10, %c0_11] : memref<1x128xf32, #tpu.memory_space<vmem>>, vector<1x128xf32>
    %16 = vector.broadcast %15 : vector<1x128xf32> to vector<8x128xf32>
    %17 = arith.addf %14, %16 : vector<8x128xf32>
    %cst_12 = arith.constant 0.000000e+00 : f32
    %18 = vector.broadcast %cst_12 : f32 to vector<8x128xf32>
    %19 = arith.cmpf oge, %17, %18 : vector<8x128xf32>
    %cst_13 = arith.constant 2.000000e-02 : f32
    %20 = vector.broadcast %cst_13 : f32 to vector<8x128xf32>
    %21 = arith.mulf %20, %17 : vector<8x128xf32>
    %22 = arith.select %19, %17, %21 : vector<8x128xi1>, vector<8x128xf32>
    %23 = arith.truncf %22 : vector<8x128xf32> to vector<8x128xbf16>
    %c0_14 = arith.constant 0 : index
    %c0_15 = arith.constant 0 : index
    %24 = vector.load %arg6[%c0_14, %c0_15] : memref<128x128xbf16, #tpu.memory_space<vmem>>, vector<128x128xbf16>
    %cst_16 = arith.constant dense<0.000000e+00> : vector<8x128xf32>
    %25 = tpu.matmul %23, %24, %cst_16 {dimension_numbers = #tpu.dot_dimension_numbers<[1], [0], [0], [1], [0, 0, 1, 1], [], []>} : vector<8x128xbf16>, vector<128x128xbf16>, vector<8x128xf32> -> vector<8x128xf32>
    %c0_17 = arith.constant 0 : index
    %c0_18 = arith.constant 0 : index
    %26 = vector.load %arg7[%c0_17, %c0_18] : memref<1x128xf32, #tpu.memory_space<vmem>>, vector<1x128xf32>
    %27 = vector.broadcast %26 : vector<1x128xf32> to vector<8x128xf32>
    %28 = arith.addf %25, %27 : vector<8x128xf32>
    %cst_19 = arith.constant 0.000000e+00 : f32
    %29 = vector.broadcast %cst_19 : f32 to vector<8x128xf32>
    %30 = arith.cmpf oge, %28, %29 : vector<8x128xf32>
    %cst_20 = arith.constant 2.000000e-02 : f32
    %31 = vector.broadcast %cst_20 : f32 to vector<8x128xf32>
    %32 = arith.mulf %31, %28 : vector<8x128xf32>
    %33 = arith.select %30, %28, %32 : vector<8x128xi1>, vector<8x128xf32>
    %34 = arith.truncf %33 : vector<8x128xf32> to vector<8x128xbf16>
    %c0_21 = arith.constant 0 : index
    %c0_22 = arith.constant 0 : index
    %35 = vector.load %arg8[%c0_21, %c0_22] : memref<128x64xbf16, #tpu.memory_space<vmem>>, vector<128x64xbf16>
    %cst_23 = arith.constant dense<0.000000e+00> : vector<8x64xf32>
    %36 = tpu.matmul %34, %35, %cst_23 {dimension_numbers = #tpu.dot_dimension_numbers<[1], [0], [0], [1], [0, 0, 1, 1], [], []>} : vector<8x128xbf16>, vector<128x64xbf16>, vector<8x64xf32> -> vector<8x64xf32>
    %c0_24 = arith.constant 0 : index
    %c0_25 = arith.constant 0 : index
    %37 = vector.load %arg9[%c0_24, %c0_25] : memref<1x64xf32, #tpu.memory_space<vmem>>, vector<1x64xf32>
    %38 = vector.broadcast %37 : vector<1x64xf32> to vector<8x64xf32>
    %39 = arith.addf %36, %38 : vector<8x64xf32>
    %cst_26 = arith.constant 0.000000e+00 : f32
    %40 = vector.broadcast %cst_26 : f32 to vector<8x64xf32>
    %41 = arith.cmpf oge, %39, %40 : vector<8x64xf32>
    %cst_27 = arith.constant 2.000000e-02 : f32
    %42 = vector.broadcast %cst_27 : f32 to vector<8x64xf32>
    %43 = arith.mulf %42, %39 : vector<8x64xf32>
    %44 = arith.select %41, %39, %43 : vector<8x64xi1>, vector<8x64xf32>
    %45 = arith.truncf %44 : vector<8x64xf32> to vector<8x64xbf16>
    %c0_28 = arith.constant 0 : index
    %c0_29 = arith.constant 0 : index
    %46 = vector.load %arg10[%c0_28, %c0_29] : memref<64x64xbf16, #tpu.memory_space<vmem>>, vector<64x64xbf16>
    %cst_30 = arith.constant dense<0.000000e+00> : vector<8x64xf32>
    %47 = tpu.matmul %45, %46, %cst_30 {dimension_numbers = #tpu.dot_dimension_numbers<[1], [0], [0], [1], [0, 0, 1, 1], [], []>} : vector<8x64xbf16>, vector<64x64xbf16>, vector<8x64xf32> -> vector<8x64xf32>
    %c0_31 = arith.constant 0 : index
    %c0_32 = arith.constant 0 : index
    %48 = vector.load %arg11[%c0_31, %c0_32] : memref<1x64xf32, #tpu.memory_space<vmem>>, vector<1x64xf32>
    %49 = vector.broadcast %48 : vector<1x64xf32> to vector<8x64xf32>
    %50 = arith.addf %47, %49 : vector<8x64xf32>
    %cst_33 = arith.constant 0.000000e+00 : f32
    %51 = vector.broadcast %cst_33 : f32 to vector<8x64xf32>
    %52 = arith.cmpf oge, %50, %51 : vector<8x64xf32>
    %cst_34 = arith.constant 2.000000e-02 : f32
    %53 = vector.broadcast %cst_34 : f32 to vector<8x64xf32>
    %54 = arith.mulf %53, %50 : vector<8x64xf32>
    %55 = arith.select %52, %50, %54 : vector<8x64xi1>, vector<8x64xf32>
    %56 = arith.truncf %55 : vector<8x64xf32> to vector<8x64xbf16>
    %c0_35 = arith.constant 0 : index
    %c0_36 = arith.constant 0 : index
    %57 = vector.load %arg12[%c0_35, %c0_36] : memref<64x128xbf16, #tpu.memory_space<vmem>>, vector<64x128xbf16>
    %cst_37 = arith.constant dense<0.000000e+00> : vector<8x128xf32>
    %58 = tpu.matmul %56, %57, %cst_37 {dimension_numbers = #tpu.dot_dimension_numbers<[1], [0], [0], [1], [0, 0, 1, 1], [], []>} : vector<8x64xbf16>, vector<64x128xbf16>, vector<8x128xf32> -> vector<8x128xf32>
    %c0_38 = arith.constant 0 : index
    %c0_39 = arith.constant 0 : index
    %59 = vector.load %arg13[%c0_38, %c0_39] : memref<1x128xf32, #tpu.memory_space<vmem>>, vector<1x128xf32>
    %60 = vector.broadcast %59 : vector<1x128xf32> to vector<8x128xf32>
    %61 = arith.addf %58, %60 : vector<8x128xf32>
    %62 = arith.truncf %61 : vector<8x128xf32> to vector<8x128xbf16>
    %c0_40 = arith.constant 0 : index
    %c0_41 = arith.constant 0 : index
    %63 = vector.load %arg14[%c0_40, %c0_41] : memref<8x128xbf16, #tpu.memory_space<vmem>>, vector<8x128xbf16>
    tpu.vector_store %arg14[%c0_40, %c0_41], %62 {strides = array<i32>} : memref<8x128xbf16, #tpu.memory_space<vmem>>, vector<8x128xbf16>,
    return
  }
  func.func @transform_0(%arg0: i32) -> (i32, i32) {
    %c0_i32 = arith.constant 0 : i32
    %c0_i32_0 = arith.constant 0 : i32
    return %arg0, %c0_i32 : i32, i32
  }
  func.func @transform_1(%arg0: i32) -> (i32, i32) {
    %c0_i32 = arith.constant 0 : i32
    %c0_i32_0 = arith.constant 0 : i32
    %c0_i32_1 = arith.constant 0 : i32
    return %c0_i32, %c0_i32_0 : i32, i32
  }
  func.func @transform_2(%arg0: i32) -> (i32, i32) {
    %c0_i32 = arith.constant 0 : i32
    %c0_i32_0 = arith.constant 0 : i32
    %c0_i32_1 = arith.constant 0 : i32
    return %c0_i32, %c0_i32_0 : i32, i32
  }
  func.func @transform_3(%arg0: i32) -> (i32, i32) {
    %c0_i32 = arith.constant 0 : i32
    %c0_i32_0 = arith.constant 0 : i32
    %c0_i32_1 = arith.constant 0 : i32
    return %c0_i32, %c0_i32_0 : i32, i32
  }
  func.func @transform_4(%arg0: i32) -> (i32, i32) {
    %c0_i32 = arith.constant 0 : i32
    %c0_i32_0 = arith.constant 0 : i32
    %c0_i32_1 = arith.constant 0 : i32
    return %c0_i32, %c0_i32_0 : i32, i32
  }
  func.func @transform_5(%arg0: i32) -> (i32, i32) {
    %c0_i32 = arith.constant 0 : i32
    %c0_i32_0 = arith.constant 0 : i32
    %c0_i32_1 = arith.constant 0 : i32
    return %c0_i32, %c0_i32_0 : i32, i32
  }
  func.func @transform_6(%arg0: i32) -> (i32, i32) {
    %c0_i32 = arith.constant 0 : i32
    %c0_i32_0 = arith.constant 0 : i32
    %c0_i32_1 = arith.constant 0 : i32
    return %c0_i32, %c0_i32_0 : i32, i32
  }
  func.func @transform_7(%arg0: i32) -> (i32, i32) {
    %c0_i32 = arith.constant 0 : i32
    %c0_i32_0 = arith.constant 0 : i32
    %c0_i32_1 = arith.constant 0 : i32
    return %c0_i32, %c0_i32_0 : i32, i32
  }
  func.func @transform_8(%arg0: i32) -> (i32, i32) {
    %c0_i32 = arith.constant 0 : i32
    %c0_i32_0 = arith.constant 0 : i32
    %c0_i32_1 = arith.constant 0 : i32
    return %c0_i32, %c0_i32_0 : i32, i32
  }
  func.func @transform_9(%arg0: i32) -> (i32, i32) {
    %c0_i32 = arith.constant 0 : i32
    %c0_i32_0 = arith.constant 0 : i32
    %c0_i32_1 = arith.constant 0 : i32
    return %c0_i32, %c0_i32_0 : i32, i32
  }
  func.func @transform_10(%arg0: i32) -> (i32, i32) {
    %c0_i32 = arith.constant 0 : i32
    %c0_i32_0 = arith.constant 0 : i32
    %c0_i32_1 = arith.constant 0 : i32
    return %c0_i32, %c0_i32_0 : i32, i32
  }
  func.func @transform_11(%arg0: i32) -> (i32, i32) {
    %c0_i32 = arith.constant 0 : i32
    %c0_i32_0 = arith.constant 0 : i32
    %c0_i32_1 = arith.constant 0 : i32
    return %c0_i32, %c0_i32_0 : i32, i32
  }
  func.func @transform_12(%arg0: i32) -> (i32, i32) {
    %c0_i32 = arith.constant 0 : i32
    %c0_i32_0 = arith.constant 0 : i32
    %c0_i32_1 = arith.constant 0 : i32
    return %c0_i32, %c0_i32_0 : i32, i32
  }
  func.func @transform_13(%arg0: i32) -> (i32, i32) {
    %c0_i32 = arith.constant 0 : i32
    %c0_i32_0 = arith.constant 0 : i32
    return %arg0, %c0_i32 : i32, i32
  }
}

</mosaic_0001>

<bundles_post_ra>
// kernel: audionet_pallas.1
= control target key start
LH: loop header
LB: loop body
LE: loop exit
PB: predicated region body
PF: predicated region fallthrough
CT: control target
= control target key end

     0   :  { %18 = vsyncpa [#allocation3], 0  ;;  %s1995_s0 = inlined_call_operand.vmem [shape: f32[8,464], index: 0, kind: input, shape index: {}]   ;;  %s1996_s1 = inlined_call_operand.hbm [shape: bf16[464,256], index: 1, kind: input, shape index: {}]   ;;  %s1997_s2 = inlined_call_operand.vmem [shape: f32[1,256], index: 2, kind: input, shape index: {}]   ;;  %s1998_s3 = inlined_call_operand.vmem [shape: bf16[256,128], index: 3, kind: input, shape index: {}]   ;;  %s1999_s4 = inlined_call_operand.hbm [shape: f32[1,128], index: 4, kind: input, shape index: {}]   ;;  %s2000_s5 = inlined_call_operand.vmem [shape: bf16[128,128], index: 5, kind: input, shape index: {}]   ;;  %s2001_s6 = inlined_call_operand.hbm [shape: f32[1,128], index: 6, kind: input, shape index: {}]   ;;  %s2002_s7 = inlined_call_operand.vmem [shape: bf16[128,64], index: 7, kind: input, shape index: {}]   ;;  %s2003_s8 = inlined_call_operand.hbm [shape: f32[1,64], index: 8, kind: input, shape index: {}]   ;;  %s2004_s9 = inlined_call_operand.vmem [shape: bf16[64,64], index: 9, kind: input, shape index: {}]   ;;  %s2005_s10 = inlined_call_operand.hbm [shape: f32[1,64], index: 10, kind: input, shape index: {}]   ;;  %s2006_s11 = inlined_call_operand.vmem [shape: bf16[64,128], index: 11, kind: input, shape index: {}]   ;;  %s2007_s12 = inlined_call_operand.hbm [shape: f32[1,128], index: 12, kind: input, shape index: {}]   ;;  %s2008_s13 = inlined_call_operand.vmem [shape: bf16[8,128], index: 13, kind: output, shape index: {}]  }
   0x1   :  { %19 = vsyncpa [#allocation5], 0 }
   0x2   :  { %20 = vsyncpa [#allocation8], 0 }
   0x3   :  { %21 = vsyncpa [#allocation11], 0  ;;  %s1670_s25 = smov [#allocation4]   ;;  %s1671_s27 = smov [#allocation7]  }
   0x4   :  { %s46_s26 = sshll.u32 %s1670_s25, 4  ;;  %s70_s28 = sshll.u32 %s1671_s27, 4  ;;  %s47_s26 = int_to_ptr.vmem [resolvable:$true] %s46_s26  ;;  %s71_s28 = int_to_ptr.vmem [resolvable:$true] %s70_s28 }
   0x5   :  { %s1530_s14 = scalar_lea.hbm %s1999_s4, 16 }
   0x6   :  { %p1531_p0 = scmp.ne.s32.totalorder %s1999_s4, %s1530_s14  ;;  %p1534_p1 = scmp.lt.u32.totalorder %s1530_s14, %s1999_s4 }
   0x8   :  { %p1536_p2 = pnand %p1534_p1, %p1531_p0 }
   0xa   :  { %1539 = shalt.err (!%p1536_p2)
}
   0xb   :  { %s1540_s19 = scalar_lea.vmem %s47_s26, 16  ;;  %s1544_s20 = scalar_lea.vmem %s47_s26, 32 }
   0xc   :  { %p1541_p3 = scmp.ne.s32.totalorder %s47_s26, %s1540_s19  ;;  %p1545_p4 = scmp.lt.s32.totalorder %s47_s26, %s47_s26 }
   0xd   :  { %p1546_p5 = scmp.lt.s32.totalorder %s1544_s20, %s1540_s19 }
   0xf   :  { %p1547_p6 = por %p1546_p5, %p1545_p4 }
  0x11   :  { %p1548_p7 = pnand %p1547_p6, %p1541_p3 }
  0x13   :  { %1551 = shalt.err (!%p1548_p7)
}
  0x14   :  { %49 = dma.hbm_to_vmem [thread:$0]  %s1999_s4, 16, %s47_s26, [#allocation5]  }
  0x15   :  { %s1552_s25 = scalar_lea.hbm %s2003_s8, 16 }
  0x16   :  { %p1553_p8 = scmp.ne.s32.totalorder %s2003_s8, %s1552_s25  ;;  %p1556_p9 = scmp.lt.u32.totalorder %s1552_s25, %s2003_s8 }
  0x18   :  { %p1558_p10 = pnand %p1556_p9, %p1553_p8 }
  0x1a   :  { %1561 = shalt.err (!%p1558_p10)
}
  0x1b   :  { %s1562_s15 = scalar_lea.vmem %s71_s28, 16  ;;  %s1566_s16 = scalar_lea.vmem %s71_s28, 32 }
  0x1c   :  { %p1563_p11 = scmp.ne.s32.totalorder %s71_s28, %s1562_s15  ;;  %p1567_p12 = scmp.lt.s32.totalorder %s71_s28, %s71_s28 }
  0x1d   :  { %p1568_p13 = scmp.lt.s32.totalorder %s1566_s16, %s1562_s15 }
  0x1f   :  { %p1569_p0 = por %p1568_p13, %p1567_p12 }
  0x21   :  { %p1570_p1 = pnand %p1569_p0, %p1563_p11 }
  0x23   :  { %1573 = shalt.err (!%p1570_p1)
}
  0x24   :  { %73 = dma.hbm_to_vmem [thread:$0]  %s2003_s8, 16, %s71_s28, [#allocation8]  }
  0x25   :  { %s1672_s17 = smov [#allocation2]   ;;  %s1574_s21 = scalar_lea.hbm %s1996_s1, 7424 }
  0x26   :  { %s29_s18 = sshll.u32 %s1672_s17, 4  ;;  %p1575_p2 = scmp.ne.s32.totalorder %s1996_s1, %s1574_s21  ;;  %s30_s18 = int_to_ptr.vmem [resolvable:$true] %s29_s18 }
  0x27   :  { %p1578_p3 = scmp.lt.u32.totalorder %s1574_s21, %s1996_s1 }
  0x29   :  { %p1580_p4 = pnand %p1578_p3, %p1575_p2 }
  0x2b   :  { %1583 = shalt.err (!%p1580_p4)
}
  0x2c   :  { %s1584_s27 = scalar_lea.vmem %s30_s18, 7424  ;;  %p1589_p6 = scmp.lt.s32.totalorder %s30_s18, %s30_s18 }
  0x2d   :  { %p1585_p5 = scmp.ne.s32.totalorder %s30_s18, %s1584_s27  ;;  %p1590_p7 = scmp.lt.s32.totalorder %s1584_s27, %s1584_s27 }
  0x2f   :  { %p1591_p8 = por %p1590_p7, %p1589_p6 }
  0x31   :  { %p1592_p9 = pnand %p1591_p8, %p1585_p5 }
  0x33   :  { %1595 = shalt.err (!%p1592_p9)
}
  0x34   :  { %s1673_s8 = smov 128   ;;  %s1674_s28 = smov 8  }
  0x35   :  { %35 = dma.hbm_to_vmem [thread:$0]  %s1996_s1, 7424, %s30_s18, [#allocation3], %s1673_s8, %s1673_s8, %s1674_s28  }
  0x36   :  { %s1675_s14 = smov [#allocation6]   ;;  %s1676_s16 = smov [#allocation9]  }
  0x37   :  { %s58_s15 = sshll.u32 %s1675_s14, 4  ;;  %s82_s4 = sshll.u32 %s1676_s16, 4  ;;  %s59_s15 = int_to_ptr.vmem [resolvable:$true] %s58_s15  ;;  %s83_s4 = int_to_ptr.vmem [resolvable:$true] %s82_s4 }
  0x38   :  { %s1596_s19 = scalar_lea.hbm %s2001_s6, 16 }
  0x39   :  { %p1597_p10 = scmp.ne.s32.totalorder %s2001_s6, %s1596_s19  ;;  %p1600_p11 = scmp.lt.u32.totalorder %s1596_s19, %s2001_s6 }
  0x3b   :  { %p1602_p12 = pnand %p1600_p11, %p1597_p10 }
  0x3d   :  { %1605 = shalt.err (!%p1602_p12)
}
  0x3e   :  { %s1606_s1 = scalar_lea.vmem %s59_s15, 16  ;;  %s1610_s18 = scalar_lea.vmem %s59_s15, 32 }
  0x3f   :  { %p1607_p13 = scmp.ne.s32.totalorder %s59_s15, %s1606_s1  ;;  %p1611_p0 = scmp.lt.s32.totalorder %s59_s15, %s59_s15 }
  0x40   :  { %p1612_p1 = scmp.lt.s32.totalorder %s1610_s18, %s1606_s1 }
  0x42   :  { %p1613_p2 = por %p1612_p1, %p1611_p0 }
  0x44   :  { %p1614_p3 = pnand %p1613_p2, %p1607_p13 }
  0x46   :  { %1617 = shalt.err (!%p1614_p3)
}
  0x47   :  { %61 = dma.hbm_to_vmem [thread:$0]  %s2001_s6, 16, %s59_s15, [#allocation5]  }
  0x48   :  { %s1618_s28 = scalar_lea.hbm %s2005_s10, 16 }
  0x49   :  { %p1619_p4 = scmp.ne.s32.totalorder %s2005_s10, %s1618_s28  ;;  %p1622_p5 = scmp.lt.u32.totalorder %s1618_s28, %s2005_s10 }
  0x4b   :  { %p1624_p6 = pnand %p1622_p5, %p1619_p4 }
  0x4d   :  { %1627 = shalt.err (!%p1624_p6)
}
  0x4e   :  { %s1628_s26 = scalar_lea.vmem %s83_s4, 16  ;;  %s1632_s17 = scalar_lea.vmem %s83_s4, 32 }
  0x4f   :  { %p1629_p7 = scmp.ne.s32.totalorder %s83_s4, %s1628_s26  ;;  %p1633_p8 = scmp.lt.s32.totalorder %s83_s4, %s83_s4 }
  0x50   :  { %p1634_p9 = scmp.lt.s32.totalorder %s1632_s17, %s1628_s26 }
  0x52   :  { %p1635_p10 = por %p1634_p9, %p1633_p8 }
  0x54   :  { %p1636_p11 = pnand %p1635_p10, %p1629_p7 }
  0x56   :  { %1639 = shalt.err (!%p1636_p11)
}
  0x57   :  { %85 = dma.hbm_to_vmem [thread:$0]  %s2005_s10, 16, %s83_s4, [#allocation8]  }
  0x58   :  { %s1677_s19 = smov [#allocation10]   ;;  %s1640_s23 = scalar_lea.hbm %s2007_s12, 16 }
  0x59   :  { %s94_s20 = sshll.u32 %s1677_s19, 4  ;;  %p1641_p12 = scmp.ne.s32.totalorder %s2007_s12, %s1640_s23  ;;  %s95_s20 = int_to_ptr.vmem [resolvable:$true] %s94_s20 }
  0x5a   :  { %p1644_p13 = scmp.lt.u32.totalorder %s1640_s23, %s2007_s12 }
  0x5c   :  { %p1646_p0 = pnand %p1644_p13, %p1641_p12 }
  0x5e   :  { %1649 = shalt.err (!%p1646_p0)
}
  0x5f   :  { %s1650_s27 = scalar_lea.vmem %s95_s20, 16  ;;  %s1654_s10 = scalar_lea.vmem %s95_s20, 32 }
  0x60   :  { %p1651_p1 = scmp.ne.s32.totalorder %s95_s20, %s1650_s27  ;;  %p1655_p2 = scmp.lt.s32.totalorder %s95_s20, %s95_s20 }
  0x61   :  { %p1656_p3 = scmp.lt.s32.totalorder %s1654_s10, %s1650_s27 }
  0x63   :  { %p1657_p4 = por %p1656_p3, %p1655_p2 }
  0x65   :  { %p1658_p5 = pnand %p1657_p4, %p1651_p1 }
  0x67   :  { %1661 = shalt.err (!%p1658_p5)
}
  0x68   :  { %97 = dma.hbm_to_vmem [thread:$0]  %s2007_s12, 16, %s95_s20, [#allocation11]  }
  0x69   :  { %1662 = dma.done.wait [#allocation3], 7424  }
  0x6a   :  { %1663 = vsyncadd [#allocation3], 4294959872 }
  0x6b   :  { %1664 = dma.done.wait [#allocation5], 32  }
  0x6c   :  { %1665 = vsyncadd [#allocation5], 4294967264 }
  0x6d   :  { %1666 = dma.done.wait [#allocation8], 32  }
  0x6e   :  { %1667 = vsyncadd [#allocation8], 4294967264 }
  0x6f   :  { %1668 = dma.done.wait [#allocation11], 16  }
  0x70   :  { %1669 = vsyncadd [#allocation11], 4294967280  ;;  %v1403_v0 = vld [vmem:[#allocation2 + $0x4] ss:$8 sps:$4 sm:$0xff]   ;;  %v1405_v1 = vld [vmem:[#allocation2] ss:$8 sps:$4 sm:$0xff]  }
  0x71   :  { %489 = vmatprep.subr.bf16.mxu0 %v1403_v0  ;;  %v1406_v2 = vld [vmem:[#allocation2 + $0x14] ss:$8 sps:$4 sm:$0xff]   ;;  %v1408_v3 = vld [vmem:[#allocation2 + $0x10] ss:$8 sps:$4 sm:$0xff]   ;;  %v1409_v4 = vld [vmem:[#allocation2 + $0x24] ss:$8 sps:$4 sm:$0xff]  }
  0x72   :  { %490 = vmatpush1.bf16.msra.mxu0 %v1405_v1  ;;  %v1411_v5 = vld [vmem:[#allocation2 + $0x20] ss:$8 sps:$4 sm:$0xff]   ;;  %v1412_v6 = vld [vmem:[#allocation2 + $0x34] ss:$8 sps:$4 sm:$0xff]   ;;  %v1414_v7 = vld [vmem:[#allocation2 + $0x30] ss:$8 sps:$4 sm:$0xff]  }
  0x73   :  { %491 = vmatprep.subr.bf16.mxu0 %v1406_v2  ;;  %v1415_v8 = vld [vmem:[#allocation2 + $0x44] ss:$8 sps:$4 sm:$0xff]   ;;  %v1417_v9 = vld [vmem:[#allocation2 + $0x40] ss:$8 sps:$4 sm:$0xff]   ;;  %v1418_v10 = vld [vmem:[#allocation2 + $0x54] ss:$8 sps:$4 sm:$0xff]  }
  0x74   :  { %v1420_v11 = vld [vmem:[#allocation2 + $0x50] ss:$8 sps:$4 sm:$0xff]   ;;  %v1421_v12 = vld [vmem:[#allocation2 + $0x64] ss:$8 sps:$4 sm:$0xff]   ;;  %v1423_v15 = vld [vmem:[#allocation2 + $0x60] ss:$8 sps:$4 sm:$0xff]  }
  0x75   :  { %v118_v13 = vld [vmem:[%s1995_s0 + $0x8] sm:$0xff]  ;;  %v1424_v16 = vld [vmem:[#allocation2 + $0x74] ss:$8 sps:$4 sm:$0xff]   ;;  %v1426_v17 = vld [vmem:[#allocation2 + $0x70] ss:$8 sps:$4 sm:$0xff]   ;;  %vm485_vm0 = vcmask 654336  }
  0x76   :  { %492 = vmatpush1.bf16.msra.mxu0 %v1408_v3  ;;  %v122_v14 = vpack.c.bf16 %v118_v13, %v118_v13  ;;  %v1427_v18 = vld [vmem:[#allocation2 + $0x84] ss:$8 sps:$4 sm:$0xff]   ;;  %v1429_v19 = vld [vmem:[#allocation2 + $0x80] ss:$8 sps:$4 sm:$0xff]   ;;  %v1430_v20 = vld [vmem:[#allocation2 + $0x94] ss:$8 sps:$4 sm:$0xff]  }
  0x77   :  { %493 = vmatprep.subr.bf16.mxu0 %v1409_v4  ;;  %v1432_v21 = vld [vmem:[#allocation2 + $0x90] ss:$8 sps:$4 sm:$0xff]   ;;  %v1433_v22 = vld [vmem:[#allocation2 + $0xa4] ss:$8 sps:$4 sm:$0xff]   ;;  %v1435_v23 = vld [vmem:[#allocation2 + $0xa0] ss:$8 sps:$4 sm:$0xff]  }
  0x78   :  { %521 = vmatprep.mubr.bf16.mxu0 %v122_v14  ;;  %v1436_v24 = vld [vmem:[#allocation2 + $0xb4] ss:$8 sps:$4 sm:$0xff]   ;;  %v1490_v25 = vld [vmem:[%s1998_s3 + $0x40] sm:$0xff]   ;;  %v1438_v26 = vld [vmem:[#allocation2 + $0xb0] ss:$8 sps:$4 sm:$0xff]   ;;  %vm1679_vm3 = vmmov 0  }
  0x79   :  { %v1491_v27 = vld [vmem:[%s1998_s3] sm:$0xff]   ;;  %1273 = vmatprep.subr.bf16.mxu1 %v1490_v25  ;;  %v1492_v29 = vld [vmem:[%s1998_s3 + $0x48] sm:$0xff]   ;;  %v1494_v31 = vld [vmem:[%s1998_s3 + $0x50] sm:$0xff]   ;;  %vm1027_vm7 = vcmask 523264  }
  0x7a   :  { %494 = vmatpush1.bf16.msra.mxu0 %v1411_v5  ;;  %v1439_v28 = vld [vmem:[#allocation2 + $0xc4] ss:$8 sps:$4 sm:$0xff]   ;;  %1274 = vmatpush3.bf16.msra.mxu1 %v1491_v27  ;;  %v1441_v32 = vld [vmem:[#allocation2 + $0xc0] ss:$8 sps:$4 sm:$0xff]   ;;  %v1442_v33 = vld [vmem:[#allocation2 + $0xd4] ss:$8 sps:$4 sm:$0xff]  }
  0x7b   :  { %495 = vmatprep.subr.bf16.mxu0 %v1412_v6  ;;  %v1493_v30 = vld [vmem:[%s1998_s3 + $0x8] sm:$0xff]   ;;  %1275 = vmatprep.subr.bf16.mxu1 %v1492_v29  ;;  %v1495_v34 = vld [vmem:[%s1998_s3 + $0x10] sm:$0xff]   ;;  %v1496_v35 = vld [vmem:[%s1998_s3 + $0x58] sm:$0xff]  }
  0x7c   :  { %v1444_v36 = vld [vmem:[#allocation2 + $0xd0] ss:$8 sps:$4 sm:$0xff]   ;;  %v1445_v37 = vld [vmem:[#allocation2 + $0xe4] ss:$8 sps:$4 sm:$0xff]   ;;  %v1447_v40 = vld [vmem:[#allocation2 + $0xe0] ss:$8 sps:$4 sm:$0xff]  }
  0x7d   :  { %v1497_v38 = vld [vmem:[%s1998_s3 + $0x18] sm:$0xff]   ;;  %v1498_v39 = vld [vmem:[%s1998_s3 + $0x60] sm:$0xff]   ;;  %v1500_v43 = vld [vmem:[%s1998_s3 + $0x68] sm:$0xff]  }
  0x7e   :  { %496 = vmatpush1.bf16.msra.mxu0 %v1414_v7  ;;  %1276 = vmatpush3.bf16.msra.mxu1 %v1493_v30  ;;  %v1499_v41 = vld [vmem:[%s1998_s3 + $0x20] sm:$0xff]   ;;  %v1448_v42 = vld [vmem:[#allocation2 + $0xf4] ss:$8 sps:$4 sm:$0xff]   ;;  %v1450_v44 = vld [vmem:[#allocation2 + $0xf0] ss:$8 sps:$4 sm:$0xff]  }
  0x7f   :  { %497 = vmatprep.subr.bf16.mxu0 %v1415_v8  ;;  %1277 = vmatprep.subr.bf16.mxu1 %v1494_v31  ;;  %v117_v45 = vld [vmem:[%s1995_s0] sm:$0xff]  ;;  %v1501_v46 = vld [vmem:[%s1998_s3 + $0x28] sm:$0xff]   ;;  %v120_v48 = vld [vmem:[%s1995_s0 + $0x18] sm:$0xff] }
  0x80   :  { %v1453_v47 = vld [vmem:[#allocation2 + $0x104] ss:$8 sps:$4 sm:$0xff]   ;;  %v1451_v49 = vld [vmem:[#allocation2 + $0x100] ss:$8 sps:$4 sm:$0xff]   ;;  %v121_v50 = vpack.c.bf16 %v117_v45, %v117_v45  ;;  %v1456_v51 = vld [vmem:[#allocation2 + $0x114] ss:$8 sps:$4 sm:$0xff]   ;;  %v124_v52 = vpack.c.bf16 %v120_v48, %v120_v48 }
  0x81   :  { %v1454_v53 = vld [vmem:[#allocation2 + $0x110] ss:$8 sps:$4 sm:$0xff]   ;;  %v1459_v54 = vld [vmem:[#allocation2 + $0x124] ss:$8 sps:$4 sm:$0xff]   ;;  %v1457_v55 = vld [vmem:[#allocation2 + $0x120] ss:$8 sps:$4 sm:$0xff]  }
  0x82   :  { %498 = vmatpush1.bf16.msra.mxu0 %v1417_v9  ;;  %1278 = vmatpush3.bf16.msra.mxu1 %v1495_v34  ;;  %v1462_v56 = vld [vmem:[#allocation2 + $0x134] ss:$8 sps:$4 sm:$0xff]   ;;  %v1460_v57 = vld [vmem:[#allocation2 + $0x130] ss:$8 sps:$4 sm:$0xff]   ;;  %v1465_v58 = vld [vmem:[#allocation2 + $0x144] ss:$8 sps:$4 sm:$0xff]  }
  0x83   :  { %499 = vmatprep.subr.bf16.mxu0 %v1418_v10  ;;  %1279 = vmatprep.subr.bf16.mxu1 %v1496_v35  ;;  %v1463_v59 = vld [vmem:[#allocation2 + $0x140] ss:$8 sps:$4 sm:$0xff]   ;;  %v1468_v60 = vld [vmem:[#allocation2 + $0x154] ss:$8 sps:$4 sm:$0xff]   ;;  %v1466_v61 = vld [vmem:[#allocation2 + $0x150] ss:$8 sps:$4 sm:$0xff]  }
  0x84   :  { %v1471_v62 = vld [vmem:[#allocation2 + $0x164] ss:$8 sps:$4 sm:$0xff]   ;;  %v1469_v63 = vld [vmem:[#allocation2 + $0x160] ss:$8 sps:$4 sm:$0xff]   ;;  %v1474_v0 = vld [vmem:[#allocation2 + $0x174] ss:$8 sps:$4 sm:$0xff]  }
  0x85   :  { %v1472_v1 = vld [vmem:[#allocation2 + $0x170] ss:$8 sps:$4 sm:$0xff]   ;;  %v1477_v2 = vld [vmem:[#allocation2 + $0x184] ss:$8 sps:$4 sm:$0xff]   ;;  %v1475_v3 = vld [vmem:[#allocation2 + $0x180] ss:$8 sps:$4 sm:$0xff]  }
  0x86   :  { %500 = vmatpush1.bf16.msra.mxu0 %v1420_v11  ;;  %1280 = vmatpush3.bf16.msra.mxu1 %v1497_v38  ;;  %v1480_v4 = vld [vmem:[#allocation2 + $0x194] ss:$8 sps:$4 sm:$0xff]   ;;  %v1478_v5 = vld [vmem:[#allocation2 + $0x190] ss:$8 sps:$4 sm:$0xff]   ;;  %v1483_v6 = vld [vmem:[#allocation2 + $0x1a4] ss:$8 sps:$4 sm:$0xff]  }
  0x87   :  { %501 = vmatprep.subr.bf16.mxu0 %v1421_v12  ;;  %1281 = vmatprep.subr.bf16.mxu1 %v1498_v39  ;;  %v1481_v7 = vld [vmem:[#allocation2 + $0x1a0] ss:$8 sps:$4 sm:$0xff]   ;;  %v1486_v8 = vld [vmem:[#allocation2 + $0x1b4] ss:$8 sps:$4 sm:$0xff]   ;;  %v1484_v9 = vld [vmem:[#allocation2 + $0x1b0] ss:$8 sps:$4 sm:$0xff]  }
  0x88   :  { %v1489_v10 = vld [vmem:[#allocation2 + $0x1c4] ss:$8 sps:$4 sm:$0xff]   ;;  %v1487_v11 = vld [vmem:[#allocation2 + $0x1c0] ss:$8 sps:$4 sm:$0xff]   ;;  %v119_v12 = vld [vmem:[%s1995_s0 + $0x10] sm:$0xff] }
  0x89   :  { %v123_v13 = vpack.c.bf16 %v119_v12, %v119_v12  ;;  %v1502_v14 = vld [vmem:[%s1998_s3 + $0x70] sm:$0xff]   ;;  %v1507_v39 = vld [vmem:[%s2000_s5 + $0x8] sm:$0xff]   ;;  %v1513_v45 = vld [vmem:[%s2000_s5 + $0x38] sm:$0xff]  }
  0x8a   :  { %502 = vmatpush1.bf16.msra.mxu0 %v1423_v15  ;;  %1282 = vmatpush3.bf16.msra.mxu1 %v1499_v41  ;;  %v1503_v15 = vld [vmem:[%s1998_s3 + $0x30] sm:$0xff]   ;;  %v1509_v41 = vld [vmem:[%s2000_s5 + $0x18] sm:$0xff]  }
  0x8b   :  { %503 = vmatprep.subr.bf16.mxu0 %v1424_v16  ;;  %1283 = vmatprep.subr.bf16.mxu1 %v1500_v43  ;;  %v1504_v16 = vld [vmem:[%s1998_s3 + $0x78] sm:$0xff]   ;;  %v1511_v43 = vld [vmem:[%s2000_s5 + $0x28] sm:$0xff]  }
  0x8c   :  { %v1525_v12 = vld [vmem:[%s2004_s9 + $0x18] sm:$0xff]  }
  0x8e   :  { %504 = vmatpush1.bf16.msra.mxu0 %v1426_v17  ;;  %1284 = vmatpush3.bf16.msra.mxu1 %v1501_v46  ;;  %v1505_v17 = vld [vmem:[%s1998_s3 + $0x38] sm:$0xff]  }
  0x8f   :  { %505 = vmatprep.subr.bf16.mxu0 %v1427_v18  ;;  %1285 = vmatprep.subr.bf16.mxu1 %v1502_v14  ;;  %v1678_v18 = vmov 0.0  }
  0x92   :  { %506 = vmatpush1.bf16.msra.mxu0 %v1429_v19  ;;  %1286 = vmatpush3.bf16.msra.mxu1 %v1503_v15  ;;  %v185_v19 = vlaneseq }
  0x93   :  { %507 = vmatprep.subr.bf16.mxu0 %v1430_v20  ;;  %1287 = vmatprep.subr.bf16.mxu1 %v1504_v16 }
  0x94   :  { %v186_v20 = vshrl.u32 %v185_v19, 7 }
  0x96   :  { %508 = vmatpush1.bf16.msra.mxu0 %v1432_v21  ;;  %1288 = vmatpush3.bf16.msra.mxu1 %v1505_v17  ;;  %v187_v21 = vsub.s32 0, %v186_v20 }
  0x97   :  { %509 = vmatprep.subr.bf16.mxu0 %v1433_v22  ;;  %1323 = vmatprep.subr.bf16.mxu1 %v1678_v18  ;;  %v183_v22 = vld [vmem:[%s1997_s2] sm:$0x3] }
  0x9a   :  { %510 = vmatpush1.bf16.msra.mxu0 %v1435_v23  ;;  %v191_v23 = vsub.s32 1, %v186_v20 }
  0x9b   :  { %511 = vmatprep.subr.bf16.mxu0 %v1436_v24  ;;  %v188_v24 = vrot.slane %v183_v22, %v187_v21 }
  0x9c   :  { %v192_v25 = vrot.slane %v183_v22, %v191_v23  ;;  %v1526_v22 = vld [vmem:[%s2006_s11] sm:$0xff]  }
  0x9e   :  { %512 = vmatpush1.bf16.msra.mxu0 %v1438_v26 }
  0x9f   :  { %513 = vmatprep.subr.bf16.mxu0 %v1439_v28 }
  0xa2   :  { %514 = vmatpush1.bf16.msra.mxu0 %v1441_v32 }
  0xa3   :  { %515 = vmatprep.subr.bf16.mxu0 %v1442_v33 }
  0xa6   :  { %516 = vmatpush1.bf16.msra.mxu0 %v1444_v36 }
  0xa7   :  { %517 = vmatprep.subr.bf16.mxu0 %v1445_v37  ;;  %v1506_v37 = vld [vmem:[%s2000_s5] sm:$0xff]  }
  0xaa   :  { %518 = vmatpush1.bf16.msra.mxu0 %v1447_v40  ;;  %v1508_v40 = vld [vmem:[%s2000_s5 + $0x10] sm:$0xff]  }
  0xab   :  { %519 = vmatprep.subr.bf16.mxu0 %v1448_v42  ;;  %v1510_v42 = vld [vmem:[%s2000_s5 + $0x20] sm:$0xff]  }
  0xae   :  { %520 = vmatpush1.bf16.msra.mxu0 %v1450_v44  ;;  %v1512_v44 = vld [vmem:[%s2000_s5 + $0x30] sm:$0xff]  }
  0xaf   :  { %530 = vmatprep.subr.bf16.mxu0 %v1453_v47  ;;  %v1226_v47 = vld [vmem:[#allocation4] ss:$0 sm:$0xff] }
  0xb1   :  { %522 = vmatmul.mubr.bf16.vlgmr.msra.gmra.mrb[0].mxu0 %v121_v50 }
  0xb2   :  { %531 = vmatpush1.bf16.msra.mxu0 %v1451_v49  ;;  %1225 = vmatprep.mubr.msk.bf16.mxu0 %vm485_vm0, %v124_v52 }
  0xb3   :  { %532 = vmatprep.subr.bf16.mxu0 %v1456_v51 }
  0xb6   :  { %533 = vmatpush1.bf16.msra.mxu0 %v1454_v53 }
  0xb7   :  { %534 = vmatprep.subr.bf16.mxu0 %v1459_v54 }
  0xba   :  { %535 = vmatpush1.bf16.msra.mxu0 %v1457_v55  ;;  %v1514_v55 = vld [vmem:[%s2002_s7] sm:$0xff]  }
  0xbb   :  { %536 = vmatprep.subr.bf16.mxu0 %v1462_v56 }
  0xbe   :  { %537 = vmatpush1.bf16.msra.mxu0 %v1460_v57  ;;  %v1515_v57 = vld [vmem:[%s2002_s7 + $0x8] sm:$0xff]  }
  0xbf   :  { %538 = vmatprep.subr.bf16.mxu0 %v1465_v58  ;;  %v1516_v58 = vld [vmem:[%s2002_s7 + $0x10] sm:$0xff]  }
  0xc2   :  { %539 = vmatpush1.bf16.msra.mxu0 %v1463_v59  ;;  %v1517_v59 = vld [vmem:[%s2002_s7 + $0x18] sm:$0xff]  }
  0xc3   :  { %540 = vmatprep.subr.bf16.mxu0 %v1468_v60  ;;  %v1518_v60 = vld [vmem:[%s2002_s7 + $0x20] sm:$0xff]  }
  0xc6   :  { %541 = vmatpush1.bf16.msra.mxu0 %v1466_v61  ;;  %v1519_v61 = vld [vmem:[%s2002_s7 + $0x28] sm:$0xff]  }
  0xc7   :  { %542 = vmatprep.subr.bf16.mxu0 %v1471_v62  ;;  %v1520_v62 = vld [vmem:[%s2002_s7 + $0x30] sm:$0xff]  }
  0xca   :  { %543 = vmatpush1.bf16.msra.mxu0 %v1469_v63  ;;  %v1521_v63 = vld [vmem:[%s2002_s7 + $0x38] sm:$0xff]  }
  0xcb   :  { %544 = vmatprep.subr.bf16.mxu0 %v1474_v0  ;;  %v1243_v0 = vld [vmem:[#allocation6] ss:$0 sm:$0xff] }
  0xce   :  { %545 = vmatpush1.bf16.msra.mxu0 %v1472_v1 }
  0xcf   :  { %546 = vmatprep.subr.bf16.mxu0 %v1477_v2 }
  0xd2   :  { %547 = vmatpush1.bf16.msra.mxu0 %v1475_v3 }
  0xd3   :  { %548 = vmatprep.subr.bf16.mxu0 %v1480_v4 }
  0xd6   :  { %549 = vmatpush1.bf16.msra.mxu0 %v1478_v5 }
  0xd7   :  { %550 = vmatprep.subr.bf16.mxu0 %v1483_v6 }
  0xda   :  { %551 = vmatpush1.bf16.msra.mxu0 %v1481_v7 }
  0xdb   :  { %552 = vmatprep.subr.bf16.mxu0 %v1486_v8  ;;  %v1522_v8 = vld [vmem:[%s2004_s9] sm:$0xff]  }
  0xde   :  { %553 = vmatpush1.bf16.msra.mxu0 %v1484_v9 }
  0xdf   :  { %554 = vmatprep.subr.bf16.mxu0 %v1489_v10  ;;  %v1523_v10 = vld [vmem:[%s2004_s9 + $0x8] sm:$0xff]  }
  0xe2   :  { %555 = vmatpush1.bf16.msra.mxu0 %v1487_v11  ;;  %v1524_v11 = vld [vmem:[%s2004_s9 + $0x10] sm:$0xff]  }
  0xe5   :  { %563 = vmatmul.mubr.bf16.vlgmr.msra.gmra.mrb[0].mxu0 %v123_v13  ;;  %v1252_v13 = vld [vmem:[#allocation7] ss:$0 sm:$0xff] }
 0x1b8   :  { %v564_v26 = vpop.f32.mrb[0].mxu0 }
 0x1b9   :  { %v1387_v27 = vadd.f32 %v564_v26, %v188_v24  ;;  %v566_v28 = vpop.f32.mrb[1].mxu0  ;;  %v1527_v24 = vld [vmem:[%s2006_s11 + $0x8] sm:$0xff]   ;;  %v1529_v26 = vld [vmem:[%s2006_s11 + $0x18] sm:$0xff]  }
 0x1ba   :  { %v1388_v29 = vadd.f32 %v566_v28, %v192_v25  ;;  %v568_v30 = vpop.f32.mrb[2].mxu0  ;;  %v1528_v25 = vld [vmem:[%s2006_s11 + $0x10] sm:$0xff]  }
 0x1bb   :  { %vm571_vm1 = vcmp.ge.f32.partialorder %v1387_v27, 0.0  ;;  %v573_v31 = vmul.f32 0.02, %v1387_v27  ;;  %v569_v32 = vpop.f32.mrb[3].mxu0 }
 0x1bc   :  { %vm572_vm2 = vcmp.ge.f32.partialorder %v1388_v29, 0.0  ;;  %v574_v33 = vmul.f32 0.02, %v1388_v29 }
 0x1bd   :  { %v575_v34 = vsel %vm571_vm1, %v1387_v27, %v573_v31  ;;  %v1261_v27 = vld [vmem:[#allocation9] ss:$0 sm:$0xff] }
 0x1be   :  { %v576_v35 = vsel %vm572_vm2, %v1388_v29, %v574_v33  ;;  %v577_v38 = vpack.c.bf16 %v575_v34, %v575_v34 }
 0x1bf   :  { %v578_v36 = vpack.c.bf16 %v576_v35, %v576_v35 }
 0x1c1   :  { %746 = vmatprep.mubr.bf16.mxu1 %v578_v36  ;;  %v1267_v36 = vld [vmem:[#allocation10] ss:$0 sm:$0xff] }
 0x1c2   :  { %747 = vmatmul.mubr.bf16.vlgmr.msra.gmra.mrb[0].mxu1 %v577_v38 }
 0x1c3   :  { %1324 = vmatpush3.bf16.msra.mxu1 %v1506_v37  ;;  %1339 = vmatprep.mubr.msk.bf16.mxu1 %vm1679_vm3, %v1678_v18 }
 0x1c4   :  { %1325 = vmatprep.subr.bf16.mxu1 %v1678_v18 }
 0x1c7   :  { %1326 = vmatpush3.bf16.msra.mxu1 %v1507_v39 }
 0x1c8   :  { %1327 = vmatprep.subr.bf16.mxu1 %v1678_v18 }
 0x1cb   :  { %1328 = vmatpush3.bf16.msra.mxu1 %v1508_v40 }
 0x1cc   :  { %1329 = vmatprep.subr.bf16.mxu1 %v1678_v18 }
 0x1cf   :  { %1330 = vmatpush3.bf16.msra.mxu1 %v1509_v41 }
 0x1d0   :  { %1331 = vmatprep.subr.bf16.mxu1 %v1678_v18 }
 0x1d3   :  { %1332 = vmatpush3.bf16.msra.mxu1 %v1510_v42 }
 0x1d4   :  { %1333 = vmatprep.subr.bf16.mxu1 %v1678_v18 }
 0x1d7   :  { %1334 = vmatpush3.bf16.msra.mxu1 %v1511_v43 }
 0x1d8   :  { %1335 = vmatprep.subr.bf16.mxu1 %v1678_v18 }
 0x1db   :  { %1336 = vmatpush3.bf16.msra.mxu1 %v1512_v44 }
 0x1dc   :  { %1337 = vmatprep.subr.bf16.mxu1 %v1678_v18 }
 0x1df   :  { %1338 = vmatpush3.bf16.msra.mxu1 %v1513_v45 }
 0x1e0   :  { %1343 = vmatprep.subr.bf16.mxu1 %v1678_v18 }
 0x295   :  { %v1289_v46 = vpop.f32.mrb[0].mxu1 }
 0x296   :  { %v1290_v48 = vpop.f32.mrb[1].mxu1 }
 0x297   :  { %v1291_v49 = vadd.f32 %v1290_v48, %v1289_v46  ;;  %v1292_v50 = vpop.f32.mrb[2].mxu1 }
 0x298   :  { %v1293_v51 = vpop.f32.mrb[3].mxu1 }
 0x299   :  { %v749_v52 = vadd.f32 %v1291_v49, %v1226_v47 }
 0x29b   :  { %vm754_vm4 = vcmp.ge.f32.partialorder %v749_v52, 0.0  ;;  %v755_v53 = vmul.f32 0.02, %v749_v52 }
 0x29d   :  { %v756_v54 = vsel %vm754_vm4, %v749_v52, %v755_v53 }
 0x29e   :  { %v757_v56 = vpack.c.bf16 %v756_v54, %v756_v54 }
 0x2a0   :  { %1340 = vmatmul.mubr.bf16.vlgmr.msra.gmra.mrb[4].mxu1 %v757_v56 }
 0x2a1   :  { %1344 = vmatpush3.bf16.msra.mxu1 %v1514_v55  ;;  %1359 = vmatprep.mubr.msk.bf16.mxu1 %vm1679_vm3, %v1678_v18 }
 0x2a2   :  { %1345 = vmatprep.subr.bf16.mxu1 %v1678_v18 }
 0x2a5   :  { %1346 = vmatpush3.bf16.msra.mxu1 %v1515_v57 }
 0x2a6   :  { %1347 = vmatprep.subr.bf16.mxu1 %v1678_v18 }
 0x2a9   :  { %1348 = vmatpush3.bf16.msra.mxu1 %v1516_v58 }
 0x2aa   :  { %1349 = vmatprep.subr.bf16.mxu1 %v1678_v18 }
 0x2ad   :  { %1350 = vmatpush3.bf16.msra.mxu1 %v1517_v59 }
 0x2ae   :  { %1351 = vmatprep.subr.bf16.mxu1 %v1678_v18 }
 0x2b1   :  { %1352 = vmatpush3.bf16.msra.mxu1 %v1518_v60 }
 0x2b2   :  { %1353 = vmatprep.subr.bf16.mxu1 %v1678_v18 }
 0x2b5   :  { %1354 = vmatpush3.bf16.msra.mxu1 %v1519_v61 }
 0x2b6   :  { %1355 = vmatprep.subr.bf16.mxu1 %v1678_v18 }
 0x2b9   :  { %1356 = vmatpush3.bf16.msra.mxu1 %v1520_v62 }
 0x2ba   :  { %1357 = vmatprep.subr.bf16.mxu1 %v1678_v18 }
 0x2bd   :  { %1358 = vmatpush3.bf16.msra.mxu1 %v1521_v63 }
 0x2be   :  { %1363 = vmatprep.subr.bf16.mxu1 %v1678_v18 }
 0x373   :  { %v863_v1 = vpop.f32.mrb[4].mxu1 }
 0x374   :  { %v864_v2 = vadd.f32 %v1243_v0, %v863_v1  ;;  %v1341_v3 = vpop.f32.mrb[5].mxu1 }
 0x375   :  { %v866_v4 = vpop.f32.mrb[6].mxu1 }
 0x376   :  { %vm869_vm5 = vcmp.ge.f32.partialorder %v864_v2, 0.0  ;;  %v870_v5 = vmul.f32 0.02, %v864_v2  ;;  %v1342_v6 = vpop.f32.mrb[7].mxu1 }
 0x378   :  { %v871_v7 = vsel %vm869_vm5, %v864_v2, %v870_v5 }
 0x379   :  { %v872_v9 = vpack.c.bf16 %v871_v7, %v871_v7 }
 0x37b   :  { %1360 = vmatmul.mubr.bf16.vlgmr.msra.gmra.mrb[8].mxu1 %v872_v9 }
 0x37c   :  { %1364 = vmatpush3.bf16.msra.mxu1 %v1522_v8  ;;  %1371 = vmatprep.mubr.msk.bf16.mxu1 %vm1679_vm3, %v1678_v18 }
 0x37d   :  { %1365 = vmatprep.subr.bf16.mxu1 %v1678_v18 }
 0x380   :  { %1366 = vmatpush3.bf16.msra.mxu1 %v1523_v10 }
 0x381   :  { %1367 = vmatprep.subr.bf16.mxu1 %v1678_v18 }
 0x384   :  { %1368 = vmatpush3.bf16.msra.mxu1 %v1524_v11 }
 0x385   :  { %1369 = vmatprep.subr.bf16.mxu1 %v1678_v18 }
 0x388   :  { %1370 = vmatpush3.bf16.msra.mxu1 %v1525_v12 }
 0x389   :  { %1375 = vmatprep.subr.bf16.mxu1 %v1678_v18 }
 0x44e   :  { %v978_v14 = vpop.f32.mrb[8].mxu1 }
 0x44f   :  { %v979_v15 = vadd.f32 %v1252_v13, %v978_v14  ;;  %v1361_v16 = vpop.f32.mrb[9].mxu1 }
 0x450   :  { %v981_v17 = vpop.f32.mrb[10].mxu1 }
 0x451   :  { %vm984_vm6 = vcmp.ge.f32.partialorder %v979_v15, 0.0  ;;  %v985_v19 = vmul.f32 0.02, %v979_v15  ;;  %v1362_v20 = vpop.f32.mrb[11].mxu1 }
 0x453   :  { %v986_v21 = vsel %vm984_vm6, %v979_v15, %v985_v19 }
 0x454   :  { %v987_v23 = vpack.c.bf16 %v986_v21, %v986_v21 }
 0x456   :  { %1372 = vmatmul.mubr.msk.bf16.vlgmr.msra.gmra.mrb[12].mxu1 %vm1027_vm7, %v987_v23 }
 0x457   :  { %1376 = vmatpush3.bf16.msra.mxu1 %v1526_v22  ;;  %1383 = vmatprep.mubr.msk.bf16.mxu1 %vm1679_vm3, %v1678_v18 }
 0x458   :  { %1377 = vmatprep.subr.bf16.mxu1 %v1678_v18 }
 0x45b   :  { %1378 = vmatpush3.bf16.msra.mxu1 %v1527_v24 }
 0x45c   :  { %1379 = vmatprep.subr.bf16.mxu1 %v1678_v18 }
 0x45f   :  { %1380 = vmatpush3.bf16.msra.mxu1 %v1528_v25 }
 0x460   :  { %1381 = vmatprep.subr.bf16.mxu1 %v1678_v18 }
 0x463   :  { %1382 = vmatpush3.bf16.msra.mxu1 %v1529_v26 }
 0x529   :  { %v1065_v28 = vpop.f32.mrb[12].mxu1 }
 0x52a   :  { %v1066_v29 = vadd.f32 %v1261_v27, %v1065_v28  ;;  %v1373_v30 = vpop.f32.mrb[13].mxu1 }
 0x52b   :  { %v1068_v31 = vpop.f32.mrb[14].mxu1 }
 0x52c   :  { %vm1071_vm8 = vcmp.ge.f32.partialorder %v1066_v29, 0.0  ;;  %v1072_v32 = vmul.f32 0.02, %v1066_v29  ;;  %v1374_v33 = vpop.f32.mrb[15].mxu1 }
 0x52e   :  { %v1073_v34 = vsel %vm1071_vm8, %v1066_v29, %v1072_v32 }
 0x52f   :  { %v1074_v35 = vpack.c.bf16 %v1073_v34, %v1073_v34 }
 0x531   :  { %1384 = vmatmul.mubr.msk.bf16.vlgmr.msra.gmra.mrb[16].mxu1 %vm1027_vm7, %v1074_v35 }
 0x604   :  { %v1151_v37 = vpop.f32.mrb[16].mxu1 }
 0x605   :  { %v1152_v18 = vadd.f32 %v1267_v36, %v1151_v37  ;;  %v1385_v38 = vpop.f32.mrb[17].mxu1 }
 0x606   :  { %v1154_v39 = vpop.f32.mrb[18].mxu1 }
 0x607   :  { %v1157_v40 = vpack.c.bf16 %v1152_v18, %v1152_v18  ;;  %v1386_v41 = vpop.f32.mrb[19].mxu1 }
 0x609   :  { %1158 = vst [vmem:[%s2008_s13] sm:$0xf] %v1157_v40 }
 0x60a   :  { %1163 = vsyncpa [#allocation3], 1 }
 0x60b   :  { %1164 = vsyncpa [#allocation5], 1 }
 0x60c   :  { %1165 = vsyncpa [#allocation8], 1 }
 0x60d   :  { %1166 = vsyncpa [#allocation11], 1 }

</bundles_post_ra>
